<compile_context>
chip_gen: v7x
topology: tpu7x:2x2x1
jax: 0.10.0
libtpu: 0.0.40
codegen_flags: <defaults>
</compile_context>

<pallas_src>
import numpy as np
import jax
import jax.numpy as jnp
from jax.experimental import pallas as pl
from jax.experimental.pallas import tpu as pltpu


def _round_up(x: int, m: int) -> int:
    return (x + m - 1) // m * m


def dense_kernel(x_ref, w_ref, a_ref, b_ref, o_ref, acc_ref):
    """One (tm, tn) output tile, accumulated over the K grid axis."""
    k = pl.program_id(2)

    @pl.when(k == 0)
    def _init():
        acc_ref[...] = jnp.zeros_like(acc_ref)

    # Mask the weight tile (growth/pruning mask) and accumulate on the MXU.
    masked_w = w_ref[...] * a_ref[...]
    acc_ref[...] += jnp.dot(x_ref[...], masked_w,
                            preferred_element_type=jnp.float32)

    @pl.when(k == pl.num_programs(2) - 1)
    def _finalize():
        y = acc_ref[...] + b_ref[...]          # (tm, tn) + (1, tn) broadcast
        o_ref[...] = jnp.maximum(y, 0.0).astype(o_ref.dtype)


def base_dense_layer_forward(x, W, A, b):
    """x: (B, D_in) f32;  W, A: (D_in, D_out) f32;  b: (D_out,) f32."""
    B, D_in = x.shape
    D_out = W.shape[1]

    # ---- tile selection (sublane/lane aligned, VMEM-safe on all gens) ----
    tm = min(_round_up(B, 8), 128)       # sublane multiple of 8
    tn = min(_round_up(D_out, 128), 512)  # lane-dense output (>=128)
    tk = min(_round_up(D_in, 128), 512)

    M_pad = _round_up(B, tm)
    N_pad = _round_up(D_out, tn)
    K_pad = _round_up(D_in, tk)

    # Zero-padding is exact: padded K rows/cols contribute 0 to the matmul,
    # padded N columns get bias 0 / ReLU(0) and are sliced off below.
    x_p = jnp.pad(x, ((0, M_pad - B), (0, K_pad - D_in)))
    W_p = jnp.pad(W, ((0, K_pad - D_in), (0, N_pad - D_out)))
    A_p = jnp.pad(A, ((0, K_pad - D_in), (0, N_pad - D_out)))
    b_p = jnp.pad(b, (0, N_pad - D_out)).reshape(1, N_pad)

    grid = (M_pad // tm, N_pad // tn, K_pad // tk)

    flops = 2 * M_pad * N_pad * K_pad
    bytes_accessed = 4 * (M_pad * K_pad + 2 * K_pad * N_pad
                          + N_pad + M_pad * N_pad)

    out_p = pl.pallas_call(
        dense_kernel,
        out_shape=jax.ShapeDtypeStruct((M_pad, N_pad), jnp.float32),
        grid_spec=pltpu.PrefetchScalarGridSpec(
            num_scalar_prefetch=0,
            grid=grid,
            in_specs=[
                pl.BlockSpec((tm, tk), lambda i, j, k: (i, k)),   # x
                pl.BlockSpec((tk, tn), lambda i, j, k: (k, j)),   # W
                pl.BlockSpec((tk, tn), lambda i, j, k: (k, j)),   # A
                pl.BlockSpec((1, tn), lambda i, j, k: (0, j)),    # b
            ],
            out_specs=pl.BlockSpec((tm, tn), lambda i, j, k: (i, j)),
            scratch_shapes=[pltpu.VMEM((tm, tn), jnp.float32)],
        ),
        compiler_params=pltpu.CompilerParams(
            dimension_semantics=("parallel", "parallel", "arbitrary"),
            vmem_limit_bytes=32 * 1024 * 1024,
        ),
        cost_estimate=pl.CostEstimate(
            flops=flops, transcendentals=0, bytes_accessed=bytes_accessed),
    )(x_p, W_p, A_p, b_p)

    return out_p[:B, :D_out]


def init_params(key, input_dim, output_dim, init_density):
    """Deterministic re-creation of BaseDenseLayer.__init__ parameter shapes.

    A: binary alive mask with ~init_density * input_dim * output_dim ones
       (indices drawn with replacement, like np.random.choice default).
    W: kaiming-uniform init, then zeroed wherever A != 1.
    b: zeros.
    """
    k_idx, k_w = jax.random.split(key)
    num_init = int(init_density * input_dim * output_dim)
    total = input_dim * output_dim

    idx = jax.random.randint(k_idx, (num_init,), 0, total)
    A_flat = jnp.zeros((total,), dtype=jnp.float32).at[idx].set(1.0)
    A = A_flat.reshape(input_dim, output_dim)

    # Kaiming-uniform bound (PyTorch uses fan_in = dim 1 of a 2-D tensor here).
    fan_in = output_dim
    bound = np.sqrt(2.0) * np.sqrt(3.0 / fan_in)
    W = jax.random.uniform(k_w, (input_dim, output_dim),
                           minval=-bound, maxval=bound, dtype=jnp.float32)
    W = W * A  # zero off-mask weights, as in __init__

    b = jnp.zeros((output_dim,), dtype=jnp.float32)
    return W, A, b


def _check(batch, input_dim, output_dim, init_density, seed):
    key = jax.random.PRNGKey(seed)
    k_params, k_x = jax.random.split(key)
    W, A, b = init_params(k_params, input_dim, output_dim, init_density)
    x = jax.random.normal(k_x, (batch, input_dim), dtype=jnp.float32)

    out = base_dense_layer_forward(x, W, A, b)
    out = jax.block_until_ready(out)

    ref = jnp.maximum(x @ (W * A) + b, 0.0)
    np.testing.assert_allclose(np.asarray(out), np.asarray(ref),
                               rtol=1e-5, atol=1e-5)


if __name__ == "__main__":
    # Small shape matching the module's defaults.
    _check(batch=8, input_dim=32, output_dim=64, init_density=0.25, seed=0)
    # Slightly larger shape that exercises a multi-tile (M, N, K) grid.
    _check(batch=160, input_dim=192, output_dim=384, init_density=0.25, seed=1)
    print("KERNEL_OK")
</pallas_src>

<mosaic_0001>
module attributes {stable_mosaic.version = 11 : i64} {
  func.func @dense_kernel(%arg0: i32, %arg1: i32, %arg2: i32, %arg3: memref<8x128xf32, #tpu.memory_space<vmem>>, %arg4: memref<128x128xf32, #tpu.memory_space<vmem>>, %arg5: memref<128x128xf32, #tpu.memory_space<vmem>>, %arg6: memref<1x128xf32, #tpu.memory_space<vmem>>, %arg7: memref<8x128xf32, #tpu.memory_space<vmem>>, %arg8: memref<8x128xf32, #tpu.memory_space<vmem>>) attributes {dimension_semantics = [#tpu.dimension_semantics<parallel>, #tpu.dimension_semantics<parallel>, #tpu.dimension_semantics<arbitrary>], iteration_bounds = array<i64: 1, 1, 1>, scalar_prefetch = 0 : i64, scratch_operands = 1 : i64, tpu.core_type = #tpu.core_type<tc>, window_params = [{transform_indices = @transform_0, window_bounds = array<i64: 8, 128>}, {transform_indices = @transform_1, window_bounds = array<i64: 128, 128>}, {transform_indices = @transform_2, window_bounds = array<i64: 128, 128>}, {transform_indices = @transform_3, window_bounds = array<i64: 1, 128>}, {transform_indices = @transform_4, window_bounds = array<i64: 8, 128>}]} {
    %c0_i32 = arith.constant 0 : i32
    %0 = arith.cmpi eq, %arg2, %c0_i32 : i32
    %1 = arith.extui %0 : i1 to i32
    %c0_i32_0 = arith.constant 0 : i32
    %2 = arith.cmpi ne, %1, %c0_i32_0 : i32
    scf.if %2 {
      %cst_12 = arith.constant 0.000000e+00 : f32
      %14 = vector.broadcast %cst_12 : f32 to vector<8x128xf32>
      %c0_13 = arith.constant 0 : index
      %c0_14 = arith.constant 0 : index
      %15 = vector.load %arg8[%c0_13, %c0_14] : memref<8x128xf32, #tpu.memory_space<vmem>>, vector<8x128xf32>
      tpu.vector_store %arg8[%c0_13, %c0_14], %14 {strides = array<i32>} : memref<8x128xf32, #tpu.memory_space<vmem>>, vector<8x128xf32>,
    } else {
    }
    %c0 = arith.constant 0 : index
    %c0_1 = arith.constant 0 : index
    %3 = vector.load %arg4[%c0, %c0_1] : memref<128x128xf32, #tpu.memory_space<vmem>>, vector<128x128xf32>
    %c0_2 = arith.constant 0 : index
    %c0_3 = arith.constant 0 : index
    %4 = vector.load %arg5[%c0_2, %c0_3] : memref<128x128xf32, #tpu.memory_space<vmem>>, vector<128x128xf32>
    %5 = arith.mulf %3, %4 : vector<128x128xf32>
    %c0_4 = arith.constant 0 : index
    %c0_5 = arith.constant 0 : index
    %6 = vector.load %arg8[%c0_4, %c0_5] : memref<8x128xf32, #tpu.memory_space<vmem>>, vector<8x128xf32>
    %c0_6 = arith.constant 0 : index
    %c0_7 = arith.constant 0 : index
    %7 = vector.load %arg3[%c0_6, %c0_7] : memref<8x128xf32, #tpu.memory_space<vmem>>, vector<8x128xf32>
    %cst = arith.constant dense<0.000000e+00> : vector<8x128xf32>
    %8 = tpu.matmul %7, %5, %cst {dimension_numbers = #tpu.dot_dimension_numbers<[1], [0], [0], [1], [0, 0, 1, 1], [], []>} : vector<8x128xf32>, vector<128x128xf32>, vector<8x128xf32> -> vector<8x128xf32>
    %9 = arith.addf %6, %8 : vector<8x128xf32>
    %c0_8 = arith.constant 0 : index
    %c0_9 = arith.constant 0 : index
    %10 = vector.load %arg8[%c0_8, %c0_9] : memref<8x128xf32, #tpu.memory_space<vmem>>, vector<8x128xf32>
    tpu.vector_store %arg8[%c0_8, %c0_9], %9 {strides = array<i32>} : memref<8x128xf32, #tpu.memory_space<vmem>>, vector<8x128xf32>,
    %c0_i32_10 = arith.constant 0 : i32
    %11 = arith.cmpi eq, %arg2, %c0_i32_10 : i32
    %12 = arith.extui %11 : i1 to i32
    %c0_i32_11 = arith.constant 0 : i32
    %13 = arith.cmpi ne, %12, %c0_i32_11 : i32
    scf.if %13 {
      %c0_12 = arith.constant 0 : index
      %c0_13 = arith.constant 0 : index
      %14 = vector.load %arg8[%c0_12, %c0_13] : memref<8x128xf32, #tpu.memory_space<vmem>>, vector<8x128xf32>
      %c0_14 = arith.constant 0 : index
      %c0_15 = arith.constant 0 : index
      %15 = vector.load %arg6[%c0_14, %c0_15] : memref<1x128xf32, #tpu.memory_space<vmem>>, vector<1x128xf32>
      %16 = vector.broadcast %15 : vector<1x128xf32> to vector<8x128xf32>
      %17 = arith.addf %14, %16 : vector<8x128xf32>
      %cst_16 = arith.constant 0.000000e+00 : f32
      %18 = vector.broadcast %cst_16 : f32 to vector<8x128xf32>
      %19 = arith.maximumf %17, %18 : vector<8x128xf32>
      %c0_17 = arith.constant 0 : index
      %c0_18 = arith.constant 0 : index
      %20 = vector.load %arg7[%c0_17, %c0_18] : memref<8x128xf32, #tpu.memory_space<vmem>>, vector<8x128xf32>
      tpu.vector_store %arg7[%c0_17, %c0_18], %19 {strides = array<i32>} : memref<8x128xf32, #tpu.memory_space<vmem>>, vector<8x128xf32>,
    } else {
    }
    return
  }
  func.func @transform_0(%arg0: i32, %arg1: i32, %arg2: i32) -> (i32, i32) {
    %c0_i32 = arith.constant 0 : i32
    return %arg0, %arg2 : i32, i32
  }
  func.func @transform_1(%arg0: i32, %arg1: i32, %arg2: i32) -> (i32, i32) {
    %c0_i32 = arith.constant 0 : i32
    return %arg2, %arg1 : i32, i32
  }
  func.func @transform_2(%arg0: i32, %arg1: i32, %arg2: i32) -> (i32, i32) {
    %c0_i32 = arith.constant 0 : i32
    return %arg2, %arg1 : i32, i32
  }
  func.func @transform_3(%arg0: i32, %arg1: i32, %arg2: i32) -> (i32, i32) {
    %c0_i32 = arith.constant 0 : i32
    %c0_i32_0 = arith.constant 0 : i32
    return %c0_i32, %arg1 : i32, i32
  }
  func.func @transform_4(%arg0: i32, %arg1: i32, %arg2: i32) -> (i32, i32) {
    %c0_i32 = arith.constant 0 : i32
    return %arg0, %arg1 : i32, i32
  }
}

</mosaic_0001>

<bundles_post_ra>
// kernel: tpu_custom_call.1
= control target key start
LH: loop header
LB: loop body
LE: loop exit
PB: predicated region body
PF: predicated region fallthrough
CT: control target
= control target key end

     0   :  { %9 = vsyncpa [#allocation4], 0  ;;  %s493_s0 = inlined_call_operand.hbm [shape: f32[8,128], index: 0, kind: input, shape index: {}]   ;;  %s494_s1 = inlined_call_operand.hbm [shape: f32[128,128], index: 1, kind: input, shape index: {}]   ;;  %s495_s2 = inlined_call_operand.hbm [shape: f32[128,128], index: 2, kind: input, shape index: {}]   ;;  %s496_s3 = inlined_call_operand.vmem [shape: f32[1,128], index: 3, kind: input, shape index: {}]   ;;  %s497_s4 = inlined_call_operand.hbm [shape: f32[8,128], index: 4, kind: output, shape index: {}]  }
   0x1   :  { %10 = vsyncpa [#allocation7], 0 }
   0x2   :  { %11 = vsyncpa [#allocation5], 0  ;;  %s394_s15 = smov [#allocation6]   ;;  %s300_s19 = scalar_lea.hbm %s494_s1, 2048 }
   0x3   :  { %s27_s16 = sshll.u32 %s394_s15, 4  ;;  %p301_p0 = scmp.ne.s32.totalorder %s494_s1, %s300_s19  ;;  %s28_s16 = int_to_ptr.vmem [resolvable:$true] %s27_s16 }
   0x4   :  { %p304_p1 = scmp.lt.u32.totalorder %s300_s19, %s494_s1 }
   0x6   :  { %p306_p2 = pnand %p304_p1, %p301_p0 }
   0x8   :  { %309 = shalt.err (!%p306_p2)
}
   0x9   :  { %s310_s24 = scalar_lea.vmem %s28_s16, 2048  ;;  %p315_p4 = scmp.lt.s32.totalorder %s28_s16, %s28_s16 }
   0xa   :  { %p311_p3 = scmp.ne.s32.totalorder %s28_s16, %s310_s24  ;;  %p316_p5 = scmp.lt.s32.totalorder %s310_s24, %s310_s24 }
   0xc   :  { %p317_p6 = por %p316_p5, %p315_p4 }
   0xe   :  { %p318_p7 = pnand %p317_p6, %p311_p3 }
  0x10   :  { %321 = shalt.err (!%p318_p7)
}
  0x11   :  { %s395_s25 = smov 128   ;;  %s396_s26 = smov 8  }
  0x12   :  { %33 = dma.hbm_to_vmem [thread:$0]  %s494_s1, 2048, %s28_s16, [#allocation7], %s395_s25, %s395_s25, %s396_s26  }
  0x13   :  { %s397_s29 = smov [#allocation3]   ;;  %s398_s5 = smov [#allocation8]  }
  0x14   :  { %s18_s30 = sshll.u32 %s397_s29, 4  ;;  %s39_s6 = sshll.u32 %s398_s5, 4  ;;  %s19_s30 = int_to_ptr.vmem [resolvable:$true] %s18_s30  ;;  %s40_s6 = int_to_ptr.vmem [resolvable:$true] %s39_s6 }
  0x15   :  { %s322_s9 = scalar_lea.hbm %s493_s0, 128 }
  0x16   :  { %p323_p8 = scmp.ne.s32.totalorder %s493_s0, %s322_s9  ;;  %p326_p9 = scmp.lt.u32.totalorder %s322_s9, %s493_s0 }
  0x18   :  { %p328_p10 = pnand %p326_p9, %p323_p8 }
  0x1a   :  { %331 = shalt.err (!%p328_p10)
}
  0x1b   :  { %s332_s1 = scalar_lea.vmem %s19_s30, 128  ;;  %p337_p12 = scmp.lt.s32.totalorder %s19_s30, %s19_s30 }
  0x1c   :  { %p333_p11 = scmp.ne.s32.totalorder %s19_s30, %s332_s1  ;;  %p338_p13 = scmp.lt.s32.totalorder %s332_s1, %s332_s1 }
  0x1e   :  { %p339_p0 = por %p338_p13, %p337_p12 }
  0x20   :  { %p340_p1 = pnand %p339_p0, %p333_p11 }
  0x22   :  { %343 = shalt.err (!%p340_p1)
}
  0x23   :  { %21 = dma.hbm_to_vmem [thread:$0]  %s493_s0, 128, %s19_s30, [#allocation4]  }
  0x24   :  { %s344_s18 = scalar_lea.hbm %s495_s2, 2048 }
  0x25   :  { %p345_p2 = scmp.ne.s32.totalorder %s495_s2, %s344_s18  ;;  %p348_p3 = scmp.lt.u32.totalorder %s344_s18, %s495_s2 }
  0x27   :  { %p350_p4 = pnand %p348_p3, %p345_p2 }
  0x29   :  { %353 = shalt.err (!%p350_p4)
}
  0x2a   :  { %s354_s23 = scalar_lea.vmem %s40_s6, 2048  ;;  %p359_p6 = scmp.lt.s32.totalorder %s40_s6, %s40_s6 }
  0x2b   :  { %p355_p5 = scmp.ne.s32.totalorder %s40_s6, %s354_s23  ;;  %p360_p7 = scmp.lt.s32.totalorder %s354_s23, %s354_s23 }
  0x2d   :  { %p361_p8 = por %p360_p7, %p359_p6 }
  0x2f   :  { %p362_p9 = pnand %p361_p8, %p355_p5 }
  0x31   :  { %365 = shalt.err (!%p362_p9)
}
  0x32   :  { %45 = dma.hbm_to_vmem [thread:$0]  %s495_s2, 2048, %s40_s6, [#allocation7], %s395_s25, %s395_s25, %s396_s26  }
  0x33   :  { %388 = dma.done.wait [#allocation4], 128  }
  0x34   :  { %389 = vsyncadd [#allocation4], 4294967168 }
  0x35   :  { %390 = dma.done.wait [#allocation7], 4096  }
  0x36   :  { %391 = vsyncadd [#allocation7], 4294963200  ;;  %v399_v0 = vmov 0.0|0.0   ;;  %vm400_vm0 = vmmov 0   ;;  %v401_v1 = vmov 0.0   ;;  %v62_v2 = vld [vmem:[#allocation6] sm:$0xff] }
  0x37   :  { %267 = vmatprep.subr.bf16.mxu0 %v399_v0  ;;  %264 = vmatprep.mubr.msk.f32.mxu0 %vm400_vm0, %v401_v1  ;;  %v63_v3 = vld [vmem:[#allocation6 + $0x8] sm:$0xff]  ;;  %v78_v4 = vld [vmem:[#allocation8] sm:$0xff]  ;;  %v64_v7 = vld [vmem:[#allocation6 + $0x10] sm:$0xff]  ;;  %s402_s26 = smov [#allocation9]  }
  0x38   :  { %v79_v5 = vld [vmem:[#allocation8 + $0x8] sm:$0xff]  ;;  %v94_v6 = vmul.f32 %v78_v4, %v62_v2  ;;  %v65_v8 = vld [vmem:[#allocation6 + $0x18] sm:$0xff]  ;;  %v80_v10 = vld [vmem:[#allocation8 + $0x10] sm:$0xff]  ;;  %s204_s27 = sshll.u32 %s402_s26, 4  ;;  %s205_s27 = int_to_ptr.vmem [resolvable:$true] %s204_s27 }
  0x39   :  { %v95_v9 = vmul.f32 %v79_v5, %v63_v3  ;;  %v81_v11 = vld [vmem:[#allocation8 + $0x18] sm:$0xff]  ;;  %v66_v12 = vld [vmem:[#allocation6 + $0x20] sm:$0xff]  ;;  %v96_v13 = vmul.f32 %v80_v10, %v64_v7  ;;  %v67_v15 = vld [vmem:[#allocation6 + $0x28] sm:$0xff]  ;;  %s366_s28 = scalar_lea.vmem %s205_s27, 128  ;;  %p371_p11 = scmp.lt.s32.totalorder %s205_s27, %s205_s27 }
  0x3a   :  { %v97_v14 = vmul.f32 %v81_v11, %v65_v8  ;;  %v82_v16 = vld [vmem:[#allocation8 + $0x20] sm:$0xff]  ;;  %v83_v17 = vld [vmem:[#allocation8 + $0x28] sm:$0xff]  ;;  %v68_v22 = vld [vmem:[#allocation6 + $0x30] sm:$0xff]  ;;  %p367_p10 = scmp.ne.s32.totalorder %s205_s27, %s366_s28  ;;  %p372_p12 = scmp.lt.s32.totalorder %s366_s28, %s366_s28 }
  0x3b   :  { %v268_v18 = vpack.c.bf16 %v95_v9, %v94_v6  ;;  %v98_v20 = vmul.f32 %v82_v16, %v66_v12  ;;  %v99_v21 = vmul.f32 %v83_v17, %v67_v15  ;;  %v69_v23 = vld [vmem:[#allocation6 + $0x38] sm:$0xff]  ;;  %v84_v24 = vld [vmem:[#allocation8 + $0x30] sm:$0xff]  ;;  %v70_v29 = vld [vmem:[#allocation6 + $0x40] sm:$0xff] }
  0x3c   :  { %v271_v19 = vpack.c.bf16 %v97_v14, %v96_v13  ;;  %v85_v25 = vld [vmem:[#allocation8 + $0x38] sm:$0xff]  ;;  %v100_v27 = vmul.f32 %v84_v24, %v68_v22  ;;  %v71_v30 = vld [vmem:[#allocation6 + $0x48] sm:$0xff]  ;;  %v86_v31 = vld [vmem:[#allocation8 + $0x40] sm:$0xff]  ;;  %p373_p13 = por %p372_p12, %p371_p11 }
  0x3d   :  { %269 = vmatpush3.bf16.msra.mxu0 %v268_v18  ;;  %v274_v26 = vpack.c.bf16 %v99_v21, %v98_v20  ;;  %v101_v28 = vmul.f32 %v85_v25, %v69_v23  ;;  %v87_v32 = vld [vmem:[#allocation8 + $0x48] sm:$0xff]  ;;  %v102_v34 = vmul.f32 %v86_v31, %v70_v29  ;;  %v72_v36 = vld [vmem:[#allocation6 + $0x50] sm:$0xff]  ;;  %v73_v37 = vld [vmem:[#allocation6 + $0x58] sm:$0xff] }
  0x3e   :  { %270 = vmatprep.subr.bf16.mxu0 %v399_v0  ;;  %v103_v35 = vmul.f32 %v87_v32, %v71_v30  ;;  %v88_v38 = vld [vmem:[#allocation8 + $0x50] sm:$0xff]  ;;  %v89_v39 = vld [vmem:[#allocation8 + $0x58] sm:$0xff]  ;;  %v74_v43 = vld [vmem:[#allocation6 + $0x60] sm:$0xff]  ;;  %p374_p0 = pnand %p373_p13, %p367_p10 }
  0x3f   :  { %v277_v33 = vpack.c.bf16 %v101_v28, %v100_v27  ;;  %v104_v41 = vmul.f32 %v88_v38, %v72_v36  ;;  %v105_v42 = vmul.f32 %v89_v39, %v73_v37  ;;  %v75_v44 = vld [vmem:[#allocation6 + $0x68] sm:$0xff]  ;;  %v90_v45 = vld [vmem:[#allocation8 + $0x60] sm:$0xff]  ;;  %v76_v50 = vld [vmem:[#allocation6 + $0x70] sm:$0xff] }
  0x40   :  { %v280_v40 = vpack.c.bf16 %v103_v35, %v102_v34  ;;  %v91_v46 = vld [vmem:[#allocation8 + $0x68] sm:$0xff]  ;;  %v106_v48 = vmul.f32 %v90_v45, %v74_v43  ;;  %v77_v51 = vld [vmem:[#allocation6 + $0x78] sm:$0xff]  ;;  %v92_v52 = vld [vmem:[#allocation8 + $0x70] sm:$0xff] }
  0x41   :  { %272 = vmatpush3.bf16.msra.mxu0 %v271_v19  ;;  %v283_v47 = vpack.c.bf16 %v105_v42, %v104_v41  ;;  %v107_v49 = vmul.f32 %v91_v46, %v75_v44  ;;  %v93_v53 = vld [vmem:[#allocation8 + $0x78] sm:$0xff]  ;;  %v108_v55 = vmul.f32 %v92_v52, %v76_v50 }
  0x42   :  { %273 = vmatprep.subr.bf16.mxu0 %v399_v0  ;;  %v109_v56 = vmul.f32 %v93_v53, %v77_v51  ;;  %v111_v58 = vld [vmem:[#allocation3] sm:$0xff] }
  0x43   :  { %v286_v54 = vpack.c.bf16 %v107_v49, %v106_v48  ;;  %v214_v59 = vld [vmem:[%s496_s3] ss:$0 sm:$0xff] }
  0x44   :  { %v289_v57 = vpack.c.bf16 %v109_v56, %v108_v55 }
  0x45   :  { %275 = vmatpush3.bf16.msra.mxu0 %v274_v26 }
  0x46   :  { %276 = vmatprep.subr.bf16.mxu0 %v399_v0 }
  0x49   :  { %278 = vmatpush3.bf16.msra.mxu0 %v277_v33 }
  0x4a   :  { %279 = vmatprep.subr.bf16.mxu0 %v399_v0 }
  0x4d   :  { %281 = vmatpush3.bf16.msra.mxu0 %v280_v40 }
  0x4e   :  { %282 = vmatprep.subr.bf16.mxu0 %v399_v0 }
  0x51   :  { %284 = vmatpush3.bf16.msra.mxu0 %v283_v47 }
  0x52   :  { %285 = vmatprep.subr.bf16.mxu0 %v399_v0 }
  0x55   :  { %287 = vmatpush3.bf16.msra.mxu0 %v286_v54 }
  0x56   :  { %288 = vmatprep.subr.bf16.mxu0 %v399_v0 }
  0x59   :  { %290 = vmatpush3.bf16.msra.mxu0 %v289_v57 }
  0x5c   :  { %265 = vmatmul.mubr.f32.vlgmr.msra.gmra.mrb[0].mxu0 %v111_v58 }
 0x12f   :  { %v178_v60 = vpop.f32.mrb[0].mxu0 }
 0x130   :  { %v195_v61 = vadd.f32 %v214_v59, %v178_v60  ;;  %v266_v62 = vpop.f32.mrb[1].mxu0 }
 0x132   :  { %v196_v63 = vmax.f32 %v195_v61, 0.0 }
 0x134   :  { %197 = vst [vmem:[#allocation9] sm:$0xff] %v196_v63 }
 0x135   :  { %377 = shalt.err (!%p374_p0)
}
 0x136   :  { %s378_s5 = scalar_lea.hbm %s497_s4, 128 }
 0x137   :  { %p379_p1 = scmp.ne.s32.totalorder %s497_s4, %s378_s5  ;;  %p382_p2 = scmp.lt.u32.totalorder %s378_s5, %s497_s4 }
 0x139   :  { %p384_p3 = pnand %p382_p2, %p379_p1 }
 0x13b   :  { %387 = shalt.err (!%p384_p3)
}
 0x13c   :  { %207 = dma.vmem_to_hbm [thread:$0]  %s205_s27, 128, %s497_s4, [#allocation5]  }
 0x13d   :  { %392 = dma.done.wait [#allocation5], 128  }
 0x13e   :  { %393 = vsyncadd [#allocation5], 4294967168 }
 0x13f   :  { %211 = vsyncpa [#allocation4], 1 }
 0x140   :  { %212 = vsyncpa [#allocation7], 1 }
 0x141   :  { %213 = vsyncpa [#allocation5], 1 }

</bundles_post_ra>
